<compile_context>
chip_gen: v5e
topology: v5e:2x2
jax: 0.10.0
libtpu: 0.0.40
codegen_flags: <defaults>
</compile_context>

<pallas_src>
import functools
import math

import jax
import jax.numpy as jnp
from jax.experimental import pallas as pl
from jax.experimental.pallas import tpu as pltpu

_LANE = 128
_SUBLANE = 8


def _round_up(x, m):
    return (x + m - 1) // m * m


def _pad2d(a, rows, cols):
    pr, pc = rows - a.shape[0], cols - a.shape[1]
    if pr or pc:
        a = jnp.pad(a, ((0, pr), (0, pc)))
    return a


def _vmem_capacity_bytes():
    # Generation-aware, with a 128 MiB fallback so an off-device / failed
    # query never rejects v5e/v6e-sized tilings.
    phys = 128 * 1024 * 1024
    try:
        phys = int(getattr(pltpu.get_tpu_info(), "vmem_capacity_bytes", phys))
    except Exception:
        pass
    return phys


def _vmem_limit_bytes():
    # Physical VMEM minus headroom: ~112 MiB on 128 MiB parts (v5e/v6e),
    # ~48 MiB on v7x's 64 MiB.  Never below 32 MiB.
    return max(32 * 1024 * 1024, _vmem_capacity_bytes() - 16 * 1024 * 1024)


def _auto_row_tile(m_rows, compute_itemsize):
    """Each row tile re-streams all of W1/W2, so make tm as large as VMEM
    allows.  On 2-TensorCore parts (v7x, 64 MiB/TC) keep >=2 row tiles so
    both cores get work on the 'parallel' axis."""
    vmem = _vmem_capacity_bytes()
    if vmem <= 64 * 1024 * 1024:                 # v7x-class
        cap = 512 if compute_itemsize <= 2 else 256
        target = -(-m_rows // 2)                 # at least two row tiles
    else:                                        # v5e / v6e (128 MiB)
        cap = 1024 if compute_itemsize <= 2 else 512
        target = m_rows                          # stream W1/W2 exactly once
    return max(_SUBLANE, min(cap, _round_up(target, _SUBLANE)))


def _gelu_f32(x, approximate):
    if approximate:
        # tanh-GELU: transcendental goes to the EUP slot (effectively free
        # next to MXU/HBM work).
        c = 0.7978845608028654  # sqrt(2/pi)
        return 0.5 * x * (1.0 + jnp.tanh(c * (x + 0.044715 * x * x * x)))
    # exact erf GELU == torch.nn.GELU() default
    return 0.5 * x * (1.0 + jax.lax.erf(x * 0.7071067811865476))


def _w3_slab_copy(w3_hbm, w3_buf, w3_sem, n, slot, tn3):
    """Async copy of W3[:, n*tn3:(n+1)*tn3] (HBM) -> w3_buf[slot] (VMEM)."""
    return pltpu.make_async_copy(
        w3_hbm.at[:, pl.ds(n * tn3, tn3)], w3_buf.at[slot], w3_sem.at[slot])


def _fused_mlp_kernel(x_ref, w1_ref, b1_ref, w2_ref, b2_ref, w3_hbm, b3_ref,
                      o_ref, acc_ref, h2_ref, w3_buf, w3_sem,
                      *, n3, tn3, approximate_gelu):
    # Grid: (row tiles [parallel], hidden-dim slabs [arbitrary / reduction]).
    k = pl.program_id(1)
    nk = pl.num_programs(1)

    @pl.when(k == 0)
    def _():
        acc_ref[...] = jnp.zeros_like(acc_ref)
        # Hide the W3 prologue: start fetching the first slab(s) while the
        # hidden-dim reduction runs.
        _w3_slab_copy(w3_hbm, w3_buf, w3_sem, 0, 0, tn3).start()
        if n3 > 1:
            _w3_slab_copy(w3_hbm, w3_buf, w3_sem, 1, 1, tn3).start()

    # Layer 1, current hidden slab: h1_k = GELU(x @ W1[:, slab] + b1[slab])
    h1 = jnp.dot(x_ref[...], w1_ref[...], preferred_element_type=jnp.float32)
    h1 = _gelu_f32(h1 + b1_ref[...].astype(jnp.float32), approximate_gelu)

    # Layer 2 partial sum: acc += h1_k @ W2[slab, :]   (f32 accumulation)
    acc_ref[...] += jnp.dot(h1.astype(w2_ref.dtype), w2_ref[...],
                            preferred_element_type=jnp.float32)

    # Finalize on the last hidden slab: GELU once (into compute-dtype
    # scratch), then layer 3 streamed over W3 column slabs.
    @pl.when(k == nk - 1)
    def _():
        h2_ref[...] = _gelu_f32(
            acc_ref[...] + b2_ref[...].astype(jnp.float32),
            approximate_gelu).astype(h2_ref.dtype)
        b3f = b3_ref[...].astype(jnp.float32)
        for n in range(n3):                       # static unroll (n3 is small)
            slot = n & 1
            _w3_slab_copy(w3_hbm, w3_buf, w3_sem, n, slot, tn3).wait()
            out = jnp.dot(h2_ref[...], w3_buf[slot],
                          preferred_element_type=jnp.float32)
            out = out + b3f[:, n * tn3:(n + 1) * tn3]
            o_ref[:, pl.ds(n * tn3, tn3)] = out.astype(o_ref.dtype)
            if n + 2 < n3:                        # refill the consumed slot
                _w3_slab_copy(w3_hbm, w3_buf, w3_sem, n + 2, slot, tn3).start()


def prepare_params(params, *, compute_dtype=None, tk_h=512, tn3_hint=512):
    """Pad weights to lane multiples and cast to the compute dtype ONCE
    (outside the per-call hot path).  Biases stay f32 (added in f32)."""
    w1, b1, w2, b2, w3, b3 = params
    fvd, hidden = w1.shape
    llm = w3.shape[1]
    cdt = jnp.dtype(compute_dtype) if compute_dtype is not None else jnp.dtype(w1.dtype)

    fvd_p = _round_up(fvd, _LANE)
    llm_p = _round_up(llm, _LANE)
    # Hidden-dim slab width (>=512 in bf16 keeps W1 column-slab DMAs dense).
    tk = min(_round_up(min(tk_h, hidden), _LANE), _round_up(hidden, _LANE))
    hid_p = _round_up(hidden, tk)
    # W3 column-slab width: largest multiple of 128 <= tn3_hint dividing llm_p.
    tn3 = min(_round_up(tn3_hint, _LANE), llm_p)
    while llm_p % tn3:
        tn3 -= _LANE

    f32 = jnp.float32
    arrays = (
        _pad2d(w1, fvd_p, hid_p).astype(cdt),
        _pad2d(jnp.reshape(b1, (1, -1)), 1, hid_p).astype(f32),
        _pad2d(w2, hid_p, llm_p).astype(cdt),
        _pad2d(jnp.reshape(b2, (1, -1)), 1, llm_p).astype(f32),
        _pad2d(w3, llm_p, llm_p).astype(cdt),
        _pad2d(jnp.reshape(b3, (1, -1)), 1, llm_p).astype(f32),
    )
    meta = dict(llm_dim=int(llm), tk=int(tk), tn3=int(tn3))
    return arrays, meta


@functools.partial(
    jax.jit, static_argnames=("llm_dim", "tk", "tn3", "tm", "approximate_gelu"))
def _fused_mlp_impl(x, w1_p, b1_p, w2_p, b2_p, w3_p, b3_p, *,
                    llm_dim, tk, tn3, tm, approximate_gelu):
    cdt = w1_p.dtype
    out_dtype = x.dtype
    fvd = x.shape[-1]
    fvd_p, hid_p = w1_p.shape
    llm_p = w3_p.shape[1]
    lead = x.shape[:-1]
    M = math.prod(lead) if lead else 1
    x2d = x.reshape(M, fvd)

    tm_eff = max(_SUBLANE,
                 min(_round_up(tm, _SUBLANE), _round_up(max(M, 1), _SUBLANE)))
    m_p = _round_up(max(M, 1), tm_eff)
    x_p = _pad2d(x2d, m_p, fvd_p).astype(cdt)

    nk = hid_p // tk
    n3 = llm_p // tn3
    grid = (m_p // tm_eff, nk)  # rows parallel, hidden reduction last

    resident = dict(pipeline_mode=pl.Buffered(1))  # tiny constant biases

    out_p = pl.pallas_call(
        functools.partial(_fused_mlp_kernel, n3=n3, tn3=tn3,
                          approximate_gelu=approximate_gelu),
        out_shape=jax.ShapeDtypeStruct((m_p, llm_p), out_dtype),
        grid_spec=pltpu.PrefetchScalarGridSpec(
            num_scalar_prefetch=0,
            grid=grid,
            in_specs=[
                pl.BlockSpec((tm_eff, fvd_p), lambda i, k: (i, 0)),   # x row tile
                pl.BlockSpec((fvd_p, tk), lambda i, k: (0, k)),       # W1 slab
                pl.BlockSpec((1, tk), lambda i, k: (0, k)),           # b1 slab
                pl.BlockSpec((tk, llm_p), lambda i, k: (k, 0)),       # W2 slab
                pl.BlockSpec((1, llm_p), lambda i, k: (0, 0), **resident),  # b2
                pl.BlockSpec(memory_space=pl.ANY),   # W3: raw HBM, streamed manually
                pl.BlockSpec((1, llm_p), lambda i, k: (0, 0), **resident),  # b3
            ],
            out_specs=pl.BlockSpec((tm_eff, llm_p), lambda i, k: (i, 0)),
            scratch_shapes=[
                pltpu.VMEM((tm_eff, llm_p), jnp.float32),  # layer-2 f32 accumulator
                pltpu.VMEM((tm_eff, llm_p), cdt),          # h2 (compute dtype, once)
                pltpu.VMEM((2, llm_p, tn3), cdt),          # W3 slab double buffer
                pltpu.SemaphoreType.DMA((2,)),
            ],
        ),
        compiler_params=pltpu.CompilerParams(
            dimension_semantics=("parallel", "arbitrary"),
            vmem_limit_bytes=_vmem_limit_bytes(),
        ),
    )(x_p, w1_p, b1_p, w2_p, b2_p, w3_p, b3_p)

    out = out_p[:M, :llm_dim]
    return out.reshape(*lead, llm_dim)


def fused_mlp_projector(x, prepared, *, tm=None, approximate_gelu=False):
    """x: (..., fused_vision_dim) -> (..., llm_dim).

    `prepared` comes from prepare_params().  approximate_gelu=False matches
    torch.nn.GELU() exactly; True is the faster tanh/EUP path.
    """
    arrays, meta = prepared
    M = math.prod(x.shape[:-1]) if x.ndim > 1 else 1
    tm_sel = tm if tm is not None else _auto_row_tile(
        max(M, 1), jnp.dtype(arrays[0].dtype).itemsize)
    return _fused_mlp_impl(x, *arrays,
                           llm_dim=meta["llm_dim"], tk=meta["tk"],
                           tn3=meta["tn3"], tm=int(tm_sel),
                           approximate_gelu=approximate_gelu)


def init_params(key, fused_vision_dim, llm_dim, dtype=jnp.float32):
    """Deterministic synthetic init matching the module's parameter shapes."""
    initial_projection_dim = fused_vision_dim * 4
    k1, k2, k3, k4, k5, k6 = jax.random.split(key, 6)

    def lin(kw, kb, fan_in, fan_out):
        scale = 1.0 / math.sqrt(fan_in)
        w = jax.random.uniform(kw, (fan_in, fan_out), dtype, -scale, scale)
        b = jax.random.uniform(kb, (1, fan_out), dtype, -scale, scale)
        return w, b

    w1, b1 = lin(k1, k2, fused_vision_dim, initial_projection_dim)
    w2, b2 = lin(k3, k4, initial_projection_dim, llm_dim)
    w3, b3 = lin(k5, k6, llm_dim, llm_dim)
    return (w1, b1, w2, b2, w3, b3)


def _reference(x, params, approximate=False):
    w1, b1, w2, b2, w3, b3 = params
    h = jax.nn.gelu(x @ w1 + b1, approximate=approximate)
    h = jax.nn.gelu(h @ w2 + b2, approximate=approximate)
    return h @ w3 + b3


if __name__ == "__main__":
    key = jax.random.PRNGKey(0)
    kx, kp, kx2, kp2 = jax.random.split(key, 4)

    # ---- Test 1: small shapes, exact (erf) GELU, f32 ------------------------
    fvd, llm = 32, 64
    batch, patches = 2, 8
    x = jax.random.normal(kx, (batch, patches, fvd), jnp.float32)
    params = init_params(kp, fvd, llm)
    prep = prepare_params(params)                       # pad + cast once (f32)

    out = jax.block_until_ready(fused_mlp_projector(x, prep))
    ref = _reference(x.reshape(-1, fvd), params).reshape(out.shape)
    assert out.shape == (batch, patches, llm)
    assert jnp.allclose(out, ref, atol=1e-4, rtol=1e-4), "f32 exact-GELU mismatch"

    # tanh-GELU fast path (EUP) vs. matching reference.
    out_t = jax.block_until_ready(
        fused_mlp_projector(x, prep, approximate_gelu=True))
    ref_t = _reference(x.reshape(-1, fvd), params,
                       approximate=True).reshape(out.shape)
    assert jnp.allclose(out_t, ref_t, atol=1e-4, rtol=1e-4), "tanh-GELU mismatch"

    # bf16 operands, f32 MXU accumulation (production path on v6e/v7x).
    prep_bf16 = prepare_params(params, compute_dtype=jnp.bfloat16)
    out_b = jax.block_until_ready(fused_mlp_projector(x, prep_bf16))
    assert jnp.allclose(out_b, ref, atol=5e-2, rtol=5e-2), "bf16 mismatch"

    # ---- Test 2: multi row-tile / multi hidden-slab / multi W3-slab path ----
    fvd2, llm2 = 96, 320                                 # hidden = 384
    x2 = jax.random.normal(kx2, (3, 8, fvd2), jnp.float32)
    params2 = init_params(kp2, fvd2, llm2)
    prep2 = prepare_params(params2, tk_h=128, tn3_hint=128)  # nk=3, n3=3
    out2 = jax.block_until_ready(fused_mlp_projector(x2, prep2, tm=8))  # 3 row tiles
    ref2 = _reference(x2.reshape(-1, fvd2), params2).reshape(out2.shape)
    assert out2.shape == (3, 8, llm2)
    assert jnp.allclose(out2, ref2, atol=5e-4, rtol=5e-4), "streamed-W3 mismatch"

    print("KERNEL_OK")
</pallas_src>

<mosaic_0001>
module attributes {stable_mosaic.version = 11 : i64} {
  func.func @_fused_mlp_kernel(%arg0: i32, %arg1: i32, %arg2: memref<16x128xf32, #tpu.memory_space<vmem>>, %arg3: memref<128x128xf32, #tpu.memory_space<vmem>>, %arg4: memref<1x128xf32, #tpu.memory_space<vmem>>, %arg5: memref<128x128xf32, #tpu.memory_space<vmem>>, %arg6: memref<1x128xf32, #tpu.memory_space<vmem>>, %arg7: memref<128x128xf32, #tpu.memory_space<any>>, %arg8: memref<1x128xf32, #tpu.memory_space<vmem>>, %arg9: memref<16x128xf32, #tpu.memory_space<vmem>>, %arg10: memref<16x128xf32, #tpu.memory_space<vmem>>, %arg11: memref<16x128xf32, #tpu.memory_space<vmem>>, %arg12: memref<2x128x128xf32, #tpu.memory_space<vmem>>, %arg13: memref<2x!tpu.dma_semaphore, #tpu.memory_space<semaphore_mem>>) attributes {dimension_semantics = [#tpu.dimension_semantics<parallel>, #tpu.dimension_semantics<arbitrary>], iteration_bounds = array<i64: 1, 1>, scalar_prefetch = 0 : i64, scratch_operands = 4 : i64, tpu.core_type = #tpu.core_type<tc>, window_params = [{transform_indices = @transform_0, window_bounds = array<i64: 16, 128>}, {transform_indices = @transform_1, window_bounds = array<i64: 128, 128>}, {transform_indices = @transform_2, window_bounds = array<i64: 1, 128>}, {transform_indices = @transform_3, window_bounds = array<i64: 128, 128>}, {pipeline_mode = #tpu.pipeline_mode<synchronous>, transform_indices = @transform_4, window_bounds = array<i64: 1, 128>}, {}, {pipeline_mode = #tpu.pipeline_mode<synchronous>, transform_indices = @transform_6, window_bounds = array<i64: 1, 128>}, {transform_indices = @transform_7, window_bounds = array<i64: 16, 128>}]} {
    %c0_i32 = arith.constant 0 : i32
    %0 = arith.cmpi eq, %arg1, %c0_i32 : i32
    %1 = arith.extui %0 : i1 to i32
    %c0_i32_0 = arith.constant 0 : i32
    %2 = arith.cmpi ne, %1, %c0_i32_0 : i32
    scf.if %2 {
      %cst_18 = arith.constant 0.000000e+00 : f32
      %25 = vector.broadcast %cst_18 : f32 to vector<16x128xf32>
      %c0_19 = arith.constant 0 : index
      %c0_20 = arith.constant 0 : index
      %26 = vector.load %arg10[%c0_19, %c0_20] : memref<16x128xf32, #tpu.memory_space<vmem>>, vector<16x128xf32>
      tpu.vector_store %arg10[%c0_19, %c0_20], %25 {strides = array<i32>} : memref<16x128xf32, #tpu.memory_space<vmem>>, vector<16x128xf32>,
      %c0_i32_21 = arith.constant 0 : i32
      %c0_i32_22 = arith.constant 0 : i32
      %c0_i32_23 = arith.constant 0 : i32
      %c0_i32_24 = arith.constant 0 : i32
      %27 = tpu.memref_slice %arg7[%c0_i32_23, %c0_i32_24] : memref<128x128xf32, #tpu.memory_space<any>> -> memref<128x128xf32, #tpu.memory_space<any>>
      %c0_i32_25 = arith.constant 0 : i32
      %c0_i32_26 = arith.constant 0 : i32
      %28 = tpu.memref_slice %arg12[%c0_i32_21, %c0_i32_25, %c0_i32_26] : memref<2x128x128xf32, #tpu.memory_space<vmem>> -> memref<1x128x128xf32, #tpu.memory_space<vmem>>
      %29 = tpu.memref_squeeze %28 : memref<1x128x128xf32, #tpu.memory_space<vmem>> -> memref<128x128xf32, #tpu.memory_space<vmem>>
      %30 = tpu.memref_slice %arg13[%c0_i32_22] : memref<2x!tpu.dma_semaphore, #tpu.memory_space<semaphore_mem>> -> memref<1x!tpu.dma_semaphore, #tpu.memory_space<semaphore_mem>>
      %31 = tpu.memref_squeeze %30 : memref<1x!tpu.dma_semaphore, #tpu.memory_space<semaphore_mem>> -> memref<!tpu.dma_semaphore, #tpu.memory_space<semaphore_mem>>
      tpu.enqueue_dma source(%27 : memref<128x128xf32, #tpu.memory_space<any>>) target(%29 : memref<128x128xf32, #tpu.memory_space<vmem>>) target_semaphore(%31 : memref<!tpu.dma_semaphore, #tpu.memory_space<semaphore_mem>>)
    } else {
    }
    %c0 = arith.constant 0 : index
    %c0_1 = arith.constant 0 : index
    %3 = vector.load %arg2[%c0, %c0_1] : memref<16x128xf32, #tpu.memory_space<vmem>>, vector<16x128xf32>
    %c0_2 = arith.constant 0 : index
    %c0_3 = arith.constant 0 : index
    %4 = vector.load %arg3[%c0_2, %c0_3] : memref<128x128xf32, #tpu.memory_space<vmem>>, vector<128x128xf32>
    %cst = arith.constant dense<0.000000e+00> : vector<16x128xf32>
    %5 = tpu.matmul %3, %4, %cst {dimension_numbers = #tpu.dot_dimension_numbers<[1], [0], [0], [1], [0, 0, 1, 1], [], []>} : vector<16x128xf32>, vector<128x128xf32>, vector<16x128xf32> -> vector<16x128xf32>
    %c0_4 = arith.constant 0 : index
    %c0_5 = arith.constant 0 : index
    %6 = vector.load %arg4[%c0_4, %c0_5] : memref<1x128xf32, #tpu.memory_space<vmem>>, vector<1x128xf32>
    %7 = vector.broadcast %6 : vector<1x128xf32> to vector<16x128xf32>
    %8 = arith.addf %5, %7 : vector<16x128xf32>
    %cst_6 = arith.constant 5.000000e-01 : f32
    %9 = vector.broadcast %cst_6 : f32 to vector<16x128xf32>
    %10 = arith.mulf %9, %8 : vector<16x128xf32>
    %cst_7 = arith.constant 0.707106769 : f32
    %11 = vector.broadcast %cst_7 : f32 to vector<16x128xf32>
    %12 = arith.mulf %8, %11 : vector<16x128xf32>
    %13 = math.erf %12 : vector<16x128xf32>
    %cst_8 = arith.constant 1.000000e+00 : f32
    %14 = vector.broadcast %cst_8 : f32 to vector<16x128xf32>
    %15 = arith.addf %14, %13 : vector<16x128xf32>
    %16 = arith.mulf %10, %15 : vector<16x128xf32>
    %c0_9 = arith.constant 0 : index
    %c0_10 = arith.constant 0 : index
    %17 = vector.load %arg10[%c0_9, %c0_10] : memref<16x128xf32, #tpu.memory_space<vmem>>, vector<16x128xf32>
    %c0_11 = arith.constant 0 : index
    %c0_12 = arith.constant 0 : index
    %18 = vector.load %arg5[%c0_11, %c0_12] : memref<128x128xf32, #tpu.memory_space<vmem>>, vector<128x128xf32>
    %cst_13 = arith.constant dense<0.000000e+00> : vector<16x128xf32>
    %19 = tpu.matmul %16, %18, %cst_13 {dimension_numbers = #tpu.dot_dimension_numbers<[1], [0], [0], [1], [0, 0, 1, 1], [], []>} : vector<16x128xf32>, vector<128x128xf32>, vector<16x128xf32> -> vector<16x128xf32>
    %20 = arith.addf %17, %19 : vector<16x128xf32>
    %c0_14 = arith.constant 0 : index
    %c0_15 = arith.constant 0 : index
    %21 = vector.load %arg10[%c0_14, %c0_15] : memref<16x128xf32, #tpu.memory_space<vmem>>, vector<16x128xf32>
    tpu.vector_store %arg10[%c0_14, %c0_15], %20 {strides = array<i32>} : memref<16x128xf32, #tpu.memory_space<vmem>>, vector<16x128xf32>,
    %c0_i32_16 = arith.constant 0 : i32
    %22 = arith.cmpi eq, %arg1, %c0_i32_16 : i32
    %23 = arith.extui %22 : i1 to i32
    %c0_i32_17 = arith.constant 0 : i32
    %24 = arith.cmpi ne, %23, %c0_i32_17 : i32
    scf.if %24 {
      %c0_18 = arith.constant 0 : index
      %c0_19 = arith.constant 0 : index
      %25 = vector.load %arg10[%c0_18, %c0_19] : memref<16x128xf32, #tpu.memory_space<vmem>>, vector<16x128xf32>
      %c0_20 = arith.constant 0 : index
      %c0_21 = arith.constant 0 : index
      %26 = vector.load %arg6[%c0_20, %c0_21] : memref<1x128xf32, #tpu.memory_space<vmem>>, vector<1x128xf32>
      %27 = vector.broadcast %26 : vector<1x128xf32> to vector<16x128xf32>
      %28 = arith.addf %25, %27 : vector<16x128xf32>
      %cst_22 = arith.constant 5.000000e-01 : f32
      %29 = vector.broadcast %cst_22 : f32 to vector<16x128xf32>
      %30 = arith.mulf %29, %28 : vector<16x128xf32>
      %cst_23 = arith.constant 0.707106769 : f32
      %31 = vector.broadcast %cst_23 : f32 to vector<16x128xf32>
      %32 = arith.mulf %28, %31 : vector<16x128xf32>
      %33 = math.erf %32 : vector<16x128xf32>
      %cst_24 = arith.constant 1.000000e+00 : f32
      %34 = vector.broadcast %cst_24 : f32 to vector<16x128xf32>
      %35 = arith.addf %34, %33 : vector<16x128xf32>
      %36 = arith.mulf %30, %35 : vector<16x128xf32>
      %c0_25 = arith.constant 0 : index
      %c0_26 = arith.constant 0 : index
      %37 = vector.load %arg11[%c0_25, %c0_26] : memref<16x128xf32, #tpu.memory_space<vmem>>, vector<16x128xf32>
      tpu.vector_store %arg11[%c0_25, %c0_26], %36 {strides = array<i32>} : memref<16x128xf32, #tpu.memory_space<vmem>>, vector<16x128xf32>,
      %c0_27 = arith.constant 0 : index
      %c0_28 = arith.constant 0 : index
      %38 = vector.load %arg8[%c0_27, %c0_28] : memref<1x128xf32, #tpu.memory_space<vmem>>, vector<1x128xf32>
      %c0_i32_29 = arith.constant 0 : i32
      %c0_i32_30 = arith.constant 0 : i32
      %c0_i32_31 = arith.constant 0 : i32
      %c0_i32_32 = arith.constant 0 : i32
      %39 = tpu.memref_slice %arg7[%c0_i32_31, %c0_i32_32] : memref<128x128xf32, #tpu.memory_space<any>> -> memref<128x128xf32, #tpu.memory_space<any>>
      %c0_i32_33 = arith.constant 0 : i32
      %c0_i32_34 = arith.constant 0 : i32
      %40 = tpu.memref_slice %arg12[%c0_i32_29, %c0_i32_33, %c0_i32_34] : memref<2x128x128xf32, #tpu.memory_space<vmem>> -> memref<1x128x128xf32, #tpu.memory_space<vmem>>
      %41 = tpu.memref_squeeze %40 : memref<1x128x128xf32, #tpu.memory_space<vmem>> -> memref<128x128xf32, #tpu.memory_space<vmem>>
      %42 = tpu.memref_slice %arg13[%c0_i32_30] : memref<2x!tpu.dma_semaphore, #tpu.memory_space<semaphore_mem>> -> memref<1x!tpu.dma_semaphore, #tpu.memory_space<semaphore_mem>>
      %43 = tpu.memref_squeeze %42 : memref<1x!tpu.dma_semaphore, #tpu.memory_space<semaphore_mem>> -> memref<!tpu.dma_semaphore, #tpu.memory_space<semaphore_mem>>
      tpu.wait_dma2 semaphore(%43 : memref<!tpu.dma_semaphore, #tpu.memory_space<semaphore_mem>>) src(%39 : memref<128x128xf32, #tpu.memory_space<any>>) dst(%41 : memref<128x128xf32, #tpu.memory_space<vmem>>)
      %c0_35 = arith.constant 0 : index
      %c0_36 = arith.constant 0 : index
      %44 = vector.load %arg11[%c0_35, %c0_36] : memref<16x128xf32, #tpu.memory_space<vmem>>, vector<16x128xf32>
      %c0_37 = arith.constant 0 : index
      %c0_38 = arith.constant 0 : index
      %c0_39 = arith.constant 0 : index
      %45 = vector.load %arg12[%c0_37, %c0_38, %c0_39] : memref<2x128x128xf32, #tpu.memory_space<vmem>>, vector<1x128x128xf32>
      %46 = vector.shape_cast %45 : vector<1x128x128xf32> to vector<128x128xf32>
      %cst_40 = arith.constant dense<0.000000e+00> : vector<16x128xf32>
      %47 = tpu.matmul %44, %46, %cst_40 {dimension_numbers = #tpu.dot_dimension_numbers<[1], [0], [0], [1], [0, 0, 1, 1], [], []>} : vector<16x128xf32>, vector<128x128xf32>, vector<16x128xf32> -> vector<16x128xf32>
      %48 = vector.broadcast %38 : vector<1x128xf32> to vector<16x128xf32>
      %49 = arith.addf %47, %48 : vector<16x128xf32>
      %c0_41 = arith.constant 0 : index
      %c0_42 = arith.constant 0 : index
      %50 = vector.load %arg9[%c0_41, %c0_42] : memref<16x128xf32, #tpu.memory_space<vmem>>, vector<16x128xf32>
      tpu.vector_store %arg9[%c0_41, %c0_42], %49 {strides = array<i32>} : memref<16x128xf32, #tpu.memory_space<vmem>>, vector<16x128xf32>,
    } else {
    }
    return
  }
  func.func @transform_0(%arg0: i32, %arg1: i32) -> (i32, i32) {
    %c0_i32 = arith.constant 0 : i32
    %c0_i32_0 = arith.constant 0 : i32
    return %arg0, %c0_i32 : i32, i32
  }
  func.func @transform_1(%arg0: i32, %arg1: i32) -> (i32, i32) {
    %c0_i32 = arith.constant 0 : i32
    %c0_i32_0 = arith.constant 0 : i32
    return %c0_i32, %arg1 : i32, i32
  }
  func.func @transform_2(%arg0: i32, %arg1: i32) -> (i32, i32) {
    %c0_i32 = arith.constant 0 : i32
    %c0_i32_0 = arith.constant 0 : i32
    return %c0_i32, %arg1 : i32, i32
  }
  func.func @transform_3(%arg0: i32, %arg1: i32) -> (i32, i32) {
    %c0_i32 = arith.constant 0 : i32
    %c0_i32_0 = arith.constant 0 : i32
    return %arg1, %c0_i32 : i32, i32
  }
  func.func @transform_4(%arg0: i32, %arg1: i32) -> (i32, i32) {
    %c0_i32 = arith.constant 0 : i32
    %c0_i32_0 = arith.constant 0 : i32
    %c0_i32_1 = arith.constant 0 : i32
    return %c0_i32, %c0_i32_0 : i32, i32
  }
  func.func @transform_6(%arg0: i32, %arg1: i32) -> (i32, i32) {
    %c0_i32 = arith.constant 0 : i32
    %c0_i32_0 = arith.constant 0 : i32
    %c0_i32_1 = arith.constant 0 : i32
    return %c0_i32, %c0_i32_0 : i32, i32
  }
  func.func @transform_7(%arg0: i32, %arg1: i32) -> (i32, i32) {
    %c0_i32 = arith.constant 0 : i32
    %c0_i32_0 = arith.constant 0 : i32
    return %arg0, %c0_i32 : i32, i32
  }
}

</mosaic_0001>

<bundles_post_ra>
// kernel: _fused_mlp_impl.1
= control target key start
LH: loop header
LB: loop body
LE: loop exit
PB: predicated region body
PF: predicated region fallthrough
CT: control target
= control target key end

     0   :  { %12 = vsyncpa [#allocation7], 0  ;;  %s647_s0 = inlined_call_operand.vmem [shape: f32[16,128], index: 0, kind: input, shape index: {}]   ;;  %s648_s1 = inlined_call_operand.hbm [shape: f32[128,128], index: 1, kind: input, shape index: {}]   ;;  %s649_s2 = inlined_call_operand.vmem [shape: f32[1,128], index: 2, kind: input, shape index: {}]   ;;  %s650_s3 = inlined_call_operand.hbm [shape: f32[128,128], index: 3, kind: input, shape index: {}]   ;;  %s651_s4 = inlined_call_operand.vmem [shape: f32[1,128], index: 4, kind: input, shape index: {}]   ;;  %s652_s5 = inlined_call_operand.hbm [shape: f32[128,128], index: 5, kind: input, shape index: {}]   ;;  %s653_s6 = inlined_call_operand.vmem [shape: f32[1,128], index: 6, kind: input, shape index: {}]   ;;  %s654_s7 = inlined_call_operand.vmem [shape: f32[16,128], index: 7, kind: output, shape index: {}]  }
   0x1   :  { %s20_s26 = sshll.u32 %s648_s1, 4  ;;  %s21_s26 = int_to_ptr.hbm [resolvable:$true] %s20_s26 }
   0x2   :  { %13 = vsyncpa [#allocation9], 0  ;;  %s538_s27 = smov [#allocation6]   ;;  %s35_s8 = sshll.u32 %s650_s3, 4  ;;  %s36_s8 = int_to_ptr.hbm [resolvable:$true] %s35_s8 }
   0x3   :  { %s22_s28 = sshll.u32 %s538_s27, 4  ;;  %s539_s9 = smov 128   ;;  %s23_s28 = int_to_ptr.vmem [resolvable:$true] %s22_s28 }
   0x4   :  { %s540_s10 = smov 8   ;;  %s541_s11 = smov [#allocation8]  }
   0x5   :  { %28 = dma.hbm_to_vmem [thread:$0]  %s21_s26, 2048, %s23_s28, [#allocation7], %s539_s9, %s539_s9, %s540_s10  }
   0x6   :  { %s37_s12 = sshll.u32 %s541_s11, 4  ;;  %s38_s12 = int_to_ptr.vmem [resolvable:$true] %s37_s12 }
   0x7   :  { %43 = dma.hbm_to_vmem [thread:$0]  %s36_s8, 2048, %s38_s12, [#allocation9], %s539_s9, %s539_s9, %s540_s10  }
   0x8   :  { %532 = dma.done.wait [#allocation7], 2048  }
   0x9   :  { %533 = vsyncadd [#allocation7], 4294965248 }
   0xa   :  { %534 = dma.done.wait [#allocation9], 2048  }
   0xb   :  { %535 = vsyncadd [#allocation9], 4294965248  ;;  %v592_v0 = vld [vmem:[%s653_s6] sm:$0x1]  ;;  %v92_v1 = vld [vmem:[#allocation6 + $0x78] sm:$0xff]  ;;  %s69_s18 = sshll.u32 %s652_s5, 4  ;;  %s70_s18 = int_to_ptr.hbm [resolvable:$true] %s69_s18 }
   0xc   :  { %v91_v2 = vld [vmem:[#allocation6 + $0x70] sm:$0xff]  ;;  %97 = vmatpush.msra.mxu0 %v92_v1  ;;  %429 = vmatpush.msra.mxu3 %v92_v1  ;;  %v90_v3 = vld [vmem:[#allocation6 + $0x68] sm:$0xff]  ;;  %v89_v4 = vld [vmem:[#allocation6 + $0x60] sm:$0xff]  ;;  %s542_s19 = smov [#allocation4]  }
   0xd   :  { %v88_v5 = vld [vmem:[#allocation6 + $0x58] sm:$0xff]  ;;  %v87_v6 = vld [vmem:[#allocation6 + $0x50] sm:$0xff]  ;;  %v86_v7 = vld [vmem:[#allocation6 + $0x48] sm:$0xff]  ;;  %s71_s20 = sshll.u32 %s542_s19, 4  ;;  %s72_s20 = int_to_ptr.vmem [resolvable:$true] %s71_s20 }
   0xe   :  { %98 = vmatpush.msra.mxu0 %v91_v2  ;;  %430 = vmatpush.msra.mxu3 %v91_v2  ;;  %v85_v8 = vld [vmem:[#allocation6 + $0x40] sm:$0xff]  ;;  %v84_v9 = vld [vmem:[#allocation6 + $0x38] sm:$0xff]  ;;  %v83_v10 = vld [vmem:[#allocation6 + $0x30] sm:$0xff]  ;;  %74 = dma.hbm_to_vmem [thread:$0]  %s70_s18, 2048, %s72_s20, [#allocation5] }
   0xf   :  { %v82_v11 = vld [vmem:[#allocation6 + $0x28] sm:$0xff]  ;;  %v81_v12 = vld [vmem:[#allocation6 + $0x20] sm:$0xff]  ;;  %v80_v13 = vld [vmem:[#allocation6 + $0x18] sm:$0xff] }
  0x10   :  { %99 = vmatpush.msra.mxu0 %v90_v3  ;;  %431 = vmatpush.msra.mxu3 %v90_v3  ;;  %v79_v14 = vld [vmem:[#allocation6 + $0x10] sm:$0xff]  ;;  %v78_v15 = vld [vmem:[#allocation6 + $0x8] sm:$0xff]  ;;  %v77_v16 = vld [vmem:[#allocation6] sm:$0xff] }
  0x11   :  { %v75_v17 = vld [vmem:[%s647_s0] sm:$0xff]  ;;  %v76_v18 = vld [vmem:[%s647_s0 + $0x8] sm:$0xff]  ;;  %v225_v19 = vld [vmem:[#allocation8 + $0x78] sm:$0xff] }
  0x12   :  { %100 = vmatpush.msra.mxu0 %v89_v4  ;;  %432 = vmatpush.msra.mxu3 %v89_v4  ;;  %v224_v20 = vld [vmem:[#allocation8 + $0x70] sm:$0xff]  ;;  %v223_v21 = vld [vmem:[#allocation8 + $0x68] sm:$0xff]  ;;  %v222_v22 = vld [vmem:[#allocation8 + $0x60] sm:$0xff] }
  0x13   :  { %226 = vmatpush.msra.mxu1 %v225_v19  ;;  %v450_v23 = vld [vmem:[%s649_s2] ss:$0 sm:$0xff]  ;;  %v221_v24 = vld [vmem:[#allocation8 + $0x58] sm:$0xff]  ;;  %v220_v26 = vld [vmem:[#allocation8 + $0x50] sm:$0xff] }
  0x14   :  { %101 = vmatpush.msra.mxu0 %v88_v5  ;;  %433 = vmatpush.msra.mxu3 %v88_v5  ;;  %v219_v28 = vld [vmem:[#allocation8 + $0x48] sm:$0xff]  ;;  %v218_v30 = vld [vmem:[#allocation8 + $0x40] sm:$0xff]  ;;  %v217_v31 = vld [vmem:[#allocation8 + $0x38] sm:$0xff] }
  0x15   :  { %227 = vmatpush.msra.mxu1 %v224_v20  ;;  %v216_v34 = vld [vmem:[#allocation8 + $0x30] sm:$0xff]  ;;  %v215_v37 = vld [vmem:[#allocation8 + $0x28] sm:$0xff]  ;;  %v214_v40 = vld [vmem:[#allocation8 + $0x20] sm:$0xff] }
  0x16   :  { %102 = vmatpush.msra.mxu0 %v87_v6  ;;  %434 = vmatpush.msra.mxu3 %v87_v6  ;;  %v213_v44 = vld [vmem:[#allocation8 + $0x18] sm:$0xff]  ;;  %v212_v48 = vld [vmem:[#allocation8 + $0x10] sm:$0xff]  ;;  %v211_v53 = vld [vmem:[#allocation8 + $0x8] sm:$0xff] }
  0x17   :  { %228 = vmatpush.msra.mxu1 %v223_v21  ;;  %v210_v57 = vld [vmem:[#allocation8] sm:$0xff] }
  0x18   :  { %103 = vmatpush.msra.mxu0 %v86_v7  ;;  %435 = vmatpush.msra.mxu3 %v86_v7 }
  0x19   :  { %229 = vmatpush.msra.mxu1 %v222_v22 }
  0x1a   :  { %104 = vmatpush.msra.mxu0 %v85_v8  ;;  %436 = vmatpush.msra.mxu3 %v85_v8 }
  0x1b   :  { %230 = vmatpush.msra.mxu1 %v221_v24 }
  0x1c   :  { %105 = vmatpush.msra.mxu0 %v84_v9  ;;  %437 = vmatpush.msra.mxu3 %v84_v9 }
  0x1d   :  { %231 = vmatpush.msra.mxu1 %v220_v26 }
  0x1e   :  { %106 = vmatpush.msra.mxu0 %v83_v10  ;;  %438 = vmatpush.msra.mxu3 %v83_v10 }
  0x1f   :  { %232 = vmatpush.msra.mxu1 %v219_v28 }
  0x20   :  { %107 = vmatpush.msra.mxu0 %v82_v11  ;;  %439 = vmatpush.msra.mxu3 %v82_v11 }
  0x21   :  { %233 = vmatpush.msra.mxu1 %v218_v30 }
  0x22   :  { %108 = vmatpush.msra.mxu0 %v81_v12  ;;  %440 = vmatpush.msra.mxu3 %v81_v12 }
  0x23   :  { %234 = vmatpush.msra.mxu1 %v217_v31 }
  0x24   :  { %109 = vmatpush.msra.mxu0 %v80_v13  ;;  %441 = vmatpush.msra.mxu3 %v80_v13 }
  0x25   :  { %235 = vmatpush.msra.mxu1 %v216_v34 }
  0x26   :  { %110 = vmatpush.msra.mxu0 %v79_v14  ;;  %442 = vmatpush.msra.mxu3 %v79_v14 }
  0x27   :  { %236 = vmatpush.msra.mxu1 %v215_v37 }
  0x28   :  { %111 = vmatpush.msra.mxu0 %v78_v15  ;;  %443 = vmatpush.msra.mxu3 %v78_v15 }
  0x29   :  { %237 = vmatpush.msra.mxu1 %v214_v40 }
  0x2a   :  { %112 = vmatpush.msra.mxu0 %v77_v16  ;;  %444 = vmatpush.msra.mxu3 %v77_v16 }
  0x2b   :  { %113 = vmatmul.f32.vlgmr.msra.gmra.mxu0 %v75_v17  ;;  %116 = vmatmul.f32.vlgmr.msra.gmra.mxu3 %v76_v18 }
  0x2c   :  { %238 = vmatpush.msra.mxu1 %v213_v44 }
  0x2e   :  { %239 = vmatpush.msra.mxu1 %v212_v48 }
  0x30   :  { %240 = vmatpush.msra.mxu1 %v211_v53 }
  0x32   :  { %241 = vmatpush.msra.mxu1 %v210_v57 }
  0xa8   :  { %v114_v25 = vpop.f32.mrf.mxu0 }
  0xa9   :  { %v603_v27 = vadd.f32 %v450_v23, %v114_v25 }
  0xab   :  { %v606_v29 = vmul.f32 0.70710677, %v603_v27 }
  0xad   :  { %v124_v32 = vmul.f32 %v606_v29, %v606_v29 }
  0xae   :  { %v117_v33 = vpop.f32.mrf.mxu3 }
  0xaf   :  { %v125_v35 = vmin.f32 %v124_v32, 16.0  ;;  %v610_v36 = vadd.f32 %v450_v23, %v117_v33 }
  0xb1   :  { %v126_v38 = vmul.f32 2.1237322e-06, %v125_v35  ;;  %v613_v39 = vmul.f32 0.70710677, %v610_v36  ;;  %v137_v41 = vmul.f32 3.8918573e-05, %v125_v35 }
  0xb3   :  { %v127_v42 = vadd.f32 0.00028619796, %v126_v38  ;;  %v164_v43 = vmul.f32 %v613_v39, %v613_v39  ;;  %v138_v45 = vadd.f32 0.001143296, %v137_v41 }
  0xb5   :  { %v128_v46 = vmul.f32 %v127_v42, %v125_v35  ;;  %v165_v47 = vmin.f32 %v164_v43, 16.0  ;;  %v139_v49 = vmul.f32 %v138_v45, %v125_v35 }
  0xb7   :  { %v166_v50 = vmul.f32 2.1237322e-06, %v165_v47  ;;  %v177_v51 = vmul.f32 3.8918573e-05, %v165_v47  ;;  %v129_v52 = vadd.f32 0.0036580483, %v128_v46 }
  0xb8   :  { %v140_v54 = vadd.f32 0.014752088, %v139_v49  ;;  %v120_v49 = vmul.f32 0.5, %v603_v27  ;;  %v451_v27 = vld [vmem:[%s651_s4] ss:$0 sm:$0xff] }
  0xb9   :  { %v167_v55 = vadd.f32 0.00028619796, %v166_v50  ;;  %v178_v56 = vadd.f32 0.001143296, %v177_v51  ;;  %v130_v61 = vmul.f32 %v129_v52, %v125_v35 }
  0xba   :  { %v141_v58 = vmul.f32 %v140_v54, %v125_v35 }
  0xbb   :  { %v168_v59 = vmul.f32 %v167_v55, %v165_v47  ;;  %v179_v60 = vmul.f32 %v178_v56, %v165_v47  ;;  %v131_v4 = vadd.f32 0.05243302, %v130_v61  ;;  %v121_v56 = vmul.f32 0.5, %v610_v36 }
  0xbc   :  { %v142_v62 = vadd.f32 0.112945676, %v141_v58 }
  0xbd   :  { %v169_v63 = vadd.f32 0.0036580483, %v168_v59  ;;  %v180_v1 = vadd.f32 0.014752088, %v179_v60  ;;  %v132_v10 = vmul.f32 %v131_v4, %v125_v35 }
  0xbe   :  { %v143_v2 = vmul.f32 %v142_v62, %v125_v35 }
  0xbf   :  { %v181_v3 = vmul.f32 %v180_v1, %v165_v47  ;;  %v170_v6 = vmul.f32 %v169_v63, %v165_v47  ;;  %v133_v15 = vadd.f32 0.18741608, %v132_v10 }
  0xc0   :  { %v144_v5 = vadd.f32 0.4994258, %v143_v2 }
  0xc1   :  { %v182_v7 = vadd.f32 0.112945676, %v181_v3  ;;  %v171_v12 = vadd.f32 0.05243302, %v170_v6  ;;  %v134_v19 = vmul.f32 %v133_v15, %v125_v35 }
  0xc2   :  { %v145_v8 = vmul.f32 %v144_v5, %v125_v35 }
  0xc3   :  { %v183_v9 = vmul.f32 %v182_v7, %v165_v47  ;;  %v172_v16 = vmul.f32 %v171_v12, %v165_v47  ;;  %v135_v23 = vadd.f32 1.1283791, %v134_v19 }
  0xc4   :  { %v146_v11 = vadd.f32 1.0, %v145_v8 }
  0xc5   :  { %v184_v13 = vadd.f32 0.4994258, %v183_v9  ;;  %v173_v20 = vadd.f32 0.18741608, %v172_v16  ;;  %v136_v33 = vmul.f32 %v135_v23, %v606_v29 }
  0xc6   :  { %452 = vrcp.f32 %v146_v11  ;;  %v158_v24 = vand.u32 2147483648, %v146_v11  ;;  %v156_v30 = vand.u32 2147483647, %v146_v11  ;;  %vm152_vm1 = vweird.f32 %v146_v11 }
  0xc7   :  { %v185_v14 = vmul.f32 %v184_v13, %v165_v47  ;;  %v174_v26 = vmul.f32 %v173_v20, %v165_v47 }
  0xc8   :  { %v159_v34 = vor.u32 1.1754944e-38, %v158_v24  ;;  %vm157_vm3 = vcmp.eq.f32.partialorder %v156_v30, 8.507059e+37 }
  0xc9   :  { %v186_v17 = vadd.f32 1.0, %v185_v14  ;;  %v175_v38 = vadd.f32 1.1283791, %v174_v26 }
  0xcb   :  { %454 = vrcp.f32 %v186_v17  ;;  %v198_v40 = vand.u32 2147483648, %v186_v17  ;;  %v196_v43 = vand.u32 2147483647, %v186_v17  ;;  %vm192_vm5 = vweird.f32 %v186_v17 }
  0xcc   :  { %v453_v18 = vpop.eup %452  ;;  %v176_v48 = vmul.f32 %v175_v38, %v613_v39 }
  0xcd   :  { %v148_v21 = vmul.f32 %v453_v18, %v146_v11  ;;  %vm153_vm0 = vweird.f32 %v453_v18  ;;  %v199_v47 = vor.u32 1.1754944e-38, %v198_v40  ;;  %vm197_vm7 = vcmp.eq.f32.partialorder %v196_v43, 8.507059e+37 }
  0xce   :  { %vm154_vm2 = vmor %vm152_vm1, %vm153_vm0 }
  0xcf   :  { %v149_v22 = vsub.f32 1.0, %v148_v21 }
  0xd1   :  { %v455_v25 = vpop.eup %454  ;;  %v150_v28 = vmul.f32 %v453_v18, %v149_v22 }
  0xd2   :  { %v188_v31 = vmul.f32 %v455_v25, %v186_v17  ;;  %vm193_vm4 = vweird.f32 %v455_v25 }
  0xd3   :  { %v151_v32 = vadd.f32 %v453_v18, %v150_v28  ;;  %vm194_vm6 = vmor %vm192_vm5, %vm193_vm4 }
  0xd4   :  { %v189_v37 = vsub.f32 1.0, %v188_v31 }
  0xd5   :  { %v155_v35 = vsel %vm154_vm2, %v453_v18, %v151_v32 }
  0xd6   :  { %v160_v41 = vsel %vm157_vm3, %v159_v34, %v155_v35  ;;  %v190_v42 = vmul.f32 %v455_v25, %v189_v37 }
  0xd7   :  { %v161_v44 = vmul.f32 %v160_v41, %v136_v33 }
  0xd8   :  { %v191_v45 = vadd.f32 %v455_v25, %v190_v42 }
  0xd9   :  { %v423_v46 = vclamps-f32 %v161_v44, 1.0 }
  0xda   :  { %v195_v29 = vsel %vm194_vm6, %v455_v25, %v191_v45 }
  0xdb   :  { %v204_v50 = vadd.f32 1.0, %v423_v46  ;;  %v200_v51 = vsel %vm197_vm7, %v199_v47, %v195_v29 }
  0xdc   :  { %v201_v52 = vmul.f32 %v200_v51, %v176_v48 }
  0xdd   :  { %v206_v53 = vmul.f32 %v204_v50, %v120_v49 }
  0xde   :  { %v424_v54 = vclamps-f32 %v201_v52, 1.0 }
  0xdf   :  { %242 = vmatmul.f32.vlgmr.msra.gmra.mxu1 %v206_v53 }
  0xe0   :  { %v205_v55 = vadd.f32 1.0, %v424_v54 }
  0xe2   :  { %v207_v57 = vmul.f32 %v205_v55, %v121_v56 }
  0xe7   :  { %245 = vmatmul.f32.gmra.mxu1 %v207_v57 }
 0x15c   :  { %v243_v39 = vpop.f32.mrf.mxu1 }
 0x15d   :  { %v627_v58 = vadd.f32 %v451_v27, %v243_v39 }
 0x15f   :  { %v266_v36 = vmul.f32 0.70710677, %v627_v58 }
 0x161   :  { %v268_v59 = vmul.f32 %v266_v36, %v266_v36 }
 0x163   :  { %v269_v60 = vmin.f32 %v268_v59, 16.0 }
 0x164   :  { %v246_v61 = vpop.f32.mrf.mxu1 }
 0x165   :  { %v270_v62 = vmul.f32 2.1237322e-06, %v269_v60  ;;  %v281_v63 = vmul.f32 3.8918573e-05, %v269_v60  ;;  %v630_v1 = vadd.f32 %v451_v27, %v246_v61 }
 0x167   :  { %v271_v2 = vadd.f32 0.00028619796, %v270_v62  ;;  %v282_v3 = vadd.f32 0.001143296, %v281_v63  ;;  %v633_v4 = vmul.f32 0.70710677, %v630_v1 }
 0x169   :  { %v272_v5 = vmul.f32 %v271_v2, %v269_v60  ;;  %v283_v6 = vmul.f32 %v282_v3, %v269_v60  ;;  %v308_v7 = vmul.f32 %v633_v4, %v633_v4  ;;  %v264_v2 = vmul.f32 0.5, %v627_v58 }
 0x16b   :  { %v284_v8 = vadd.f32 0.014752088, %v283_v6  ;;  %v273_v9 = vadd.f32 0.0036580483, %v272_v5  ;;  %v309_v10 = vmin.f32 %v308_v7, 16.0 }
 0x16d   :  { %v285_v11 = vmul.f32 %v284_v8, %v269_v60  ;;  %v310_v12 = vmul.f32 2.1237322e-06, %v309_v10  ;;  %v321_v13 = vmul.f32 3.8918573e-05, %v309_v10  ;;  %v274_v15 = vmul.f32 %v273_v9, %v269_v60 }
 0x16f   :  { %v286_v14 = vadd.f32 0.112945676, %v285_v11  ;;  %v311_v16 = vadd.f32 0.00028619796, %v310_v12  ;;  %v322_v17 = vadd.f32 0.001143296, %v321_v13 }
 0x170   :  { %v275_v22 = vadd.f32 0.05243302, %v274_v15  ;;  %v265_v12 = vmul.f32 0.5, %v630_v1 }
 0x171   :  { %v287_v18 = vmul.f32 %v286_v14, %v269_v60  ;;  %v312_v19 = vmul.f32 %v311_v16, %v309_v10  ;;  %v323_v20 = vmul.f32 %v322_v17, %v309_v10 }
 0x172   :  { %v276_v30 = vmul.f32 %v275_v22, %v269_v60 }
 0x173   :  { %v288_v21 = vadd.f32 0.4994258, %v287_v18  ;;  %v324_v23 = vadd.f32 0.014752088, %v323_v20  ;;  %v313_v25 = vadd.f32 0.0036580483, %v312_v19 }
 0x174   :  { %v277_v34 = vadd.f32 0.18741608, %v276_v30 }
 0x175   :  { %v289_v24 = vmul.f32 %v288_v21, %v269_v60  ;;  %v325_v26 = vmul.f32 %v324_v23, %v309_v10  ;;  %v314_v32 = vmul.f32 %v313_v25, %v309_v10 }
 0x176   :  { %v278_v41 = vmul.f32 %v277_v34, %v269_v60 }
 0x177   :  { %v290_v28 = vadd.f32 1.0, %v289_v24  ;;  %v326_v31 = vadd.f32 0.112945676, %v325_v26  ;;  %v315_v38 = vadd.f32 0.05243302, %v314_v32 }
 0x178   :  { %v279_v47 = vadd.f32 1.1283791, %v278_v41 }
 0x179   :  { %456 = vrcp.f32 %v290_v28  ;;  %v327_v33 = vmul.f32 %v326_v31, %v309_v10  ;;  %v316_v44 = vmul.f32 %v315_v38, %v309_v10  ;;  %v302_v46 = vand.u32 2147483648, %v290_v28 }
 0x17a   :  { %v300_v29 = vand.u32 2147483647, %v290_v28  ;;  %vm296_vm9 = vweird.f32 %v290_v28  ;;  %v280_v53 = vmul.f32 %v279_v47, %v266_v36 }
 0x17b   :  { %v328_v37 = vadd.f32 0.4994258, %v327_v33  ;;  %v317_v49 = vadd.f32 0.18741608, %v316_v44  ;;  %v303_v51 = vor.u32 1.1754944e-38, %v302_v46 }
 0x17c   :  { %vm301_vm11 = vcmp.eq.f32.partialorder %v300_v29, 8.507059e+37 }
 0x17d   :  { %v329_v35 = vmul.f32 %v328_v37, %v309_v10  ;;  %v318_v56 = vmul.f32 %v317_v49, %v309_v10 }
 0x17f   :  { %v457_v40 = vpop.eup %456  ;;  %v330_v43 = vadd.f32 1.0, %v329_v35  ;;  %v319_v61 = vadd.f32 1.1283791, %v318_v56 }
 0x180   :  { %v292_v42 = vmul.f32 %v457_v40, %v290_v28  ;;  %vm297_vm8 = vweird.f32 %v457_v40 }
 0x181   :  { %458 = vrcp.f32 %v330_v43  ;;  %vm298_vm10 = vmor %vm296_vm9, %vm297_vm8  ;;  %v342_v60 = vand.u32 2147483648, %v330_v43  ;;  %v340_v63 = vand.u32 2147483647, %v330_v43  ;;  %vm336_vm13 = vweird.f32 %v330_v43 }
 0x182   :  { %v293_v45 = vsub.f32 1.0, %v292_v42  ;;  %v320_v7 = vmul.f32 %v319_v61, %v633_v4 }
 0x183   :  { %v343_v36 = vor.u32 1.1754944e-38, %v342_v60  ;;  %vm341_vm15 = vcmp.eq.f32.partialorder %v340_v63, 8.507059e+37 }
 0x184   :  { %v294_v48 = vmul.f32 %v457_v40, %v293_v45 }
 0x186   :  { %v295_v50 = vadd.f32 %v457_v40, %v294_v48 }
 0x187   :  { %v459_v52 = vpop.eup %458 }
 0x188   :  { %v299_v54 = vsel %vm298_vm10, %v457_v40, %v295_v50  ;;  %v332_v57 = vmul.f32 %v459_v52, %v330_v43  ;;  %vm337_vm12 = vweird.f32 %v459_v52 }
 0x189   :  { %v304_v55 = vsel %vm301_vm11, %v303_v51, %v299_v54  ;;  %vm338_vm14 = vmor %vm336_vm13, %vm337_vm12 }
 0x18a   :  { %v305_v27 = vmul.f32 %v304_v55, %v280_v53  ;;  %v333_v39 = vsub.f32 1.0, %v332_v57 }
 0x18c   :  { %v425_v59 = vclamps-f32 %v305_v27, 1.0  ;;  %v334_v62 = vmul.f32 %v459_v52, %v333_v39 }
 0x18e   :  { %v348_v3 = vadd.f32 1.0, %v425_v59  ;;  %v335_v5 = vadd.f32 %v459_v52, %v334_v62 }
 0x190   :  { %v350_v6 = vmul.f32 %v348_v3, %v264_v2  ;;  %v339_v8 = vsel %vm338_vm14, %v459_v52, %v335_v5 }
 0x191   :  { %v344_v9 = vsel %vm341_vm15, %v343_v36, %v339_v8 }
 0x192   :  { %v345_v10 = vmul.f32 %v344_v9, %v320_v7 }
 0x194   :  { %v426_v11 = vclamps-f32 %v345_v10, 1.0 }
 0x196   :  { %v349_v13 = vadd.f32 1.0, %v426_v11 }
 0x198   :  { %v351_v14 = vmul.f32 %v349_v13, %v265_v12 }
 0x199   :  { %536 = dma.done.wait [#allocation5], 2048 }
 0x19a   :  { %537 = vsyncadd [#allocation5], 4294965248  ;;  %v375_v58 = vld [vmem:[#allocation4 + $0x78] sm:$0xff]  ;;  %v374_v15 = vld [vmem:[#allocation4 + $0x70] sm:$0xff]  ;;  %v377_v30 = vperm.slane %v592_v0, 0 }
 0x19b   :  { %379 = vmatpush.msra.mxu2 %v375_v58  ;;  %v373_v16 = vld [vmem:[#allocation4 + $0x68] sm:$0xff]  ;;  %v372_v17 = vld [vmem:[#allocation4 + $0x60] sm:$0xff]  ;;  %v371_v18 = vld [vmem:[#allocation4 + $0x58] sm:$0xff] }
 0x19c   :  { %v370_v4 = vld [vmem:[#allocation4 + $0x50] sm:$0xff]  ;;  %v369_v19 = vld [vmem:[#allocation4 + $0x48] sm:$0xff]  ;;  %v368_v20 = vld [vmem:[#allocation4 + $0x40] sm:$0xff] }
 0x19d   :  { %380 = vmatpush.msra.mxu2 %v374_v15  ;;  %v367_v1 = vld [vmem:[#allocation4 + $0x38] sm:$0xff]  ;;  %v366_v21 = vld [vmem:[#allocation4 + $0x30] sm:$0xff]  ;;  %v365_v22 = vld [vmem:[#allocation4 + $0x28] sm:$0xff] }
 0x19e   :  { %v364_v23 = vld [vmem:[#allocation4 + $0x20] sm:$0xff]  ;;  %v363_v24 = vld [vmem:[#allocation4 + $0x18] sm:$0xff]  ;;  %v362_v25 = vld [vmem:[#allocation4 + $0x10] sm:$0xff] }
 0x19f   :  { %381 = vmatpush.msra.mxu2 %v373_v16  ;;  %v361_v26 = vld [vmem:[#allocation4 + $0x8] sm:$0xff]  ;;  %v360_v28 = vld [vmem:[#allocation4] sm:$0xff] }
 0x1a1   :  { %382 = vmatpush.msra.mxu2 %v372_v17 }
 0x1a3   :  { %383 = vmatpush.msra.mxu2 %v371_v18 }
 0x1a5   :  { %384 = vmatpush.msra.mxu2 %v370_v4 }
 0x1a7   :  { %385 = vmatpush.msra.mxu2 %v369_v19 }
 0x1a9   :  { %386 = vmatpush.msra.mxu2 %v368_v20 }
 0x1ab   :  { %387 = vmatpush.msra.mxu2 %v367_v1 }
 0x1ad   :  { %388 = vmatpush.msra.mxu2 %v366_v21 }
 0x1af   :  { %389 = vmatpush.msra.mxu2 %v365_v22 }
 0x1b1   :  { %390 = vmatpush.msra.mxu2 %v364_v23 }
 0x1b3   :  { %391 = vmatpush.msra.mxu2 %v363_v24 }
 0x1b5   :  { %392 = vmatpush.msra.mxu2 %v362_v25 }
 0x1b7   :  { %393 = vmatpush.msra.mxu2 %v361_v26 }
 0x1b9   :  { %394 = vmatpush.msra.mxu2 %v360_v28 }
 0x1ba   :  { %395 = vmatmul.f32.vlgmr.msra.gmra.mxu2 %v350_v6 }
 0x1c2   :  { %398 = vmatmul.f32.gmra.mxu2 %v351_v14 }
 0x23d   :  { %v396_v31 = vpop.f32.mrf.mxu2 }
 0x23e   :  { %v397_v32 = vadd.f32 %v396_v31, %v377_v30 }
 0x240   :  { %402 = vst [vmem:[%s654_s7] sm:$0xff] %v397_v32 }
 0x245   :  { %v399_v33 = vpop.f32.mrf.mxu2 }
 0x246   :  { %v400_v34 = vadd.f32 %v399_v33, %v377_v30 }
 0x248   :  { %403 = vst [vmem:[%s654_s7 + $0x8] sm:$0xff] %v400_v34 }
 0x249   :  { %408 = vsyncpa [#allocation7], 1 }
 0x24a   :  { %409 = vsyncpa [#allocation9], 1 }
 0x24b   :  { %410 = vsyncmov [#allocation5] }
 0x24e   :  { %s411_s25 = vpop.sfrf %410 }
 0x24f   :  { %p427_p0 = scmp.ne.s32.totalorder %s411_s25, 0 }
 0x251   :  { %415 = shalt.err (%p427_p0)  }
 0x252   :  { %417 = vsyncmov [#allocation5 + $0x1] }
 0x255   :  { %s418_s26 = vpop.sfrf %417 }
 0x256   :  { %p428_p1 = scmp.ne.s32.totalorder %s418_s26, 0 }
 0x258   :  { %422 = shalt.err (%p428_p1)  }

</bundles_post_ra>
